<compile_context>
chip_gen: v6e
topology: v6e:2x2x1
jax: 0.10.0
libtpu: 0.0.40
codegen_flags: <defaults>
</compile_context>

<pallas_src>
import functools

import jax
import jax.numpy as jnp
from jax.experimental import pallas as pl
from jax.experimental.pallas import tpu as pltpu

WIDTH = 128    # lane width; every packed feature dim is padded to this
TILE_B = 128   # states per grid step (multiple of 8 sublanes, MXU-friendly M)


def fused_actor_critic_kernel(x_ref, w_ref, b_ref, out_ref, *, action_size):
    """One grid step pushes TILE_B states through BOTH the actor and the
    critic MLP at once (block-diagonal fused weights).

    x_ref:   (TILE_B, 128) f32   states, zero-padded on lanes >= state_size
    w_ref:   (4, 128, 128) bf16  block-diagonal fused actor/critic weights
    b_ref:   (4, 1, 128)   f32   fused biases
    out_ref: (TILE_B, 128) f32   lanes 0..A-1 = probs, lane A = value, rest 0
    """
    h = x_ref[...]
    # Statically unrolled; w_ref[i]/b_ref[i] are zero-cost ref views.  Do NOT
    # preload all four tiles into values (would burn ~32 vregs for nothing).
    for i in range(4):
        h = (
            jnp.dot(
                h.astype(jnp.bfloat16),
                w_ref[i],
                preferred_element_type=jnp.float32,
            )
            + b_ref[i]
        )
        if i < 3:
            h = jnp.maximum(h, 0.0)

    # After layer 4: lanes 0..A-1 hold actor logits, lane A the critic value,
    # lanes A+1.. are exactly zero (zero-padded weights/biases).
    col = jax.lax.broadcasted_iota(jnp.int32, h.shape, 1)
    is_logit = col < action_size
    logits = jnp.where(is_logit, h, -1e30)
    m = jnp.max(logits, axis=-1, keepdims=True)
    # exp(-1e30 - m) underflows to exactly +0.0 in IEEE f32, so the masked
    # lanes contribute nothing to the denominator (no second mask needed).
    e = jnp.exp(logits - m)
    denom = jnp.sum(e, axis=-1, keepdims=True)
    # Exact division so every row of probs sums to 1 to f32 precision.
    probs = e / denom

    # Single full-lane (unmasked) store: probs everywhere except lane A = value.
    out_ref[...] = jnp.where(col == action_size, h, probs)


@functools.partial(jax.jit, static_argnames=("action_size", "tile_b"))
def actor_critic_forward(state, w_slab, b_slab, *, action_size, tile_b=TILE_B):
    """state: (B, state_size) f32. Returns (probs (B, A), value (B, 1))."""
    B, S = state.shape
    num_tiles = pl.cdiv(B, tile_b)
    b_pad = num_tiles * tile_b
    # Single pad op (fuses better than zeros + scatter).
    x = jnp.pad(state, ((0, b_pad - B), (0, WIDTH - S)))

    out = pl.pallas_call(
        functools.partial(fused_actor_critic_kernel, action_size=action_size),
        out_shape=jax.ShapeDtypeStruct((b_pad, WIDTH), jnp.float32),
        grid=(num_tiles,),
        in_specs=[
            pl.BlockSpec((tile_b, WIDTH), lambda i: (i, 0)),
            # Constant index_map -> weight/bias slabs DMA'd once, VMEM-resident
            # across all grid steps.
            pl.BlockSpec((4, WIDTH, WIDTH), lambda i: (0, 0, 0)),
            pl.BlockSpec((4, 1, WIDTH), lambda i: (0, 0, 0)),
        ],
        out_specs=pl.BlockSpec((tile_b, WIDTH), lambda i: (i, 0)),
        compiler_params=pltpu.CompilerParams(
            dimension_semantics=("parallel",)  # megacore sharding on v7x
        ),
    )(x, w_slab, b_slab)

    probs = out[:B, :action_size]
    value = out[:B, action_size:action_size + 1]
    return probs, value


def init_linear(key, fan_in, fan_out):
    """nn.Linear-style U(-1/sqrt(in), 1/sqrt(in)); weight stored as (in, out)."""
    kw, kb = jax.random.split(key)
    bound = 1.0 / jnp.sqrt(jnp.float32(fan_in))
    w = jax.random.uniform(
        kw, (fan_in, fan_out), jnp.float32, minval=-bound, maxval=bound
    )
    b = jax.random.uniform(
        kb, (1, fan_out), jnp.float32, minval=-bound, maxval=bound
    )
    return w, b


def make_params(key, state_size, action_size, num_hidden):
    keys = jax.random.split(key, 8)
    actor = [
        init_linear(keys[0], state_size, num_hidden),
        init_linear(keys[1], num_hidden, num_hidden),
        init_linear(keys[2], num_hidden, num_hidden),
        init_linear(keys[3], num_hidden, action_size),
    ]
    critic = [
        init_linear(keys[4], state_size, num_hidden),
        init_linear(keys[5], num_hidden, num_hidden),
        init_linear(keys[6], num_hidden, num_hidden),
        init_linear(keys[7], num_hidden, 1),
    ]
    return actor, critic


def pack_params(actor_params, critic_params, state_size, action_size, num_hidden):
    """Fuse actor+critic into block-diagonal (4, 128, 128) bf16 weights and
    (4, 1, 128) f32 biases, zero-padded to the 128-lane width."""
    H = num_hidden
    assert max(state_size, 2 * H, action_size + 1) <= WIDTH

    W = jnp.zeros((4, WIDTH, WIDTH), jnp.float32)
    Bv = jnp.zeros((4, 1, WIDTH), jnp.float32)

    (aw1, ab1), (aw2, ab2), (aw3, ab3), (aw4, ab4) = actor_params
    (cw1, cb1), (cw2, cb2), (cw3, cb3), (cw4, cb4) = critic_params

    # Layer 1: concat along out -> cols [0:H]=actor, [H:2H]=critic.
    W = W.at[0, :state_size, :H].set(aw1)
    W = W.at[0, :state_size, H:2 * H].set(cw1)
    Bv = Bv.at[0, 0, :H].set(ab1[0])
    Bv = Bv.at[0, 0, H:2 * H].set(cb1[0])

    # Layers 2 & 3: block diagonal (actor top-left, critic bottom-right).
    for li, (aw, ab, cw, cb) in ((1, (aw2, ab2, cw2, cb2)),
                                 (2, (aw3, ab3, cw3, cb3))):
        W = W.at[li, :H, :H].set(aw)
        W = W.at[li, H:2 * H, H:2 * H].set(cw)
        Bv = Bv.at[li, 0, :H].set(ab[0])
        Bv = Bv.at[li, 0, H:2 * H].set(cb[0])

    # Layer 4: actor head -> lanes [0:A], critic head -> lane A.
    W = W.at[3, :H, :action_size].set(aw4)
    W = W.at[3, H:2 * H, action_size:action_size + 1].set(cw4)
    Bv = Bv.at[3, 0, :action_size].set(ab4[0])
    Bv = Bv.at[3, 0, action_size].set(cb4[0, 0])

    return W.astype(jnp.bfloat16), Bv


def reference_forward(state, actor_params, critic_params):
    """Pure-JAX reference with matching precision (bf16 matmul inputs,
    f32 accumulation) so the comparison isolates kernel/packing bugs."""
    def mlp(x, params):
        h = x
        for i, (w, b) in enumerate(params):
            h = jnp.dot(
                h.astype(jnp.bfloat16),
                w.astype(jnp.bfloat16),
                preferred_element_type=jnp.float32,
            ) + b
            if i < len(params) - 1:
                h = jnp.maximum(h, 0.0)
        return h

    logits = mlp(state, actor_params)
    probs = jax.nn.softmax(logits, axis=1)
    value = mlp(state, critic_params)
    return probs, value


def check(probs, value, ref_probs, ref_value, batch, action_size):
    assert probs.shape == (batch, action_size)
    assert value.shape == (batch, 1)
    assert jnp.allclose(probs, ref_probs, atol=2e-3, rtol=2e-3)
    assert jnp.allclose(value, ref_value, atol=1e-3, rtol=1e-3)
    # Exact division in the kernel -> rows sum to 1 to f32 precision.
    assert jnp.allclose(jnp.sum(probs, axis=1), 1.0, atol=1e-5)


if __name__ == "__main__":
    batch = 8
    state_size = 8
    action_size = 4
    num_hidden = 32

    key = jax.random.PRNGKey(0)
    k_params, k_state, k_state_big = jax.random.split(key, 3)

    actor_params, critic_params = make_params(
        k_params, state_size, action_size, num_hidden
    )
    w_slab, b_slab = pack_params(
        actor_params, critic_params, state_size, action_size, num_hidden
    )

    # Small batch: one grid step (batch zero-padded up to TILE_B rows).
    state = jax.random.normal(k_state, (batch, state_size), jnp.float32)
    probs, value = actor_critic_forward(
        state, w_slab, b_slab, action_size=action_size
    )
    probs, value = jax.block_until_ready((probs, value))
    ref_probs, ref_value = reference_forward(state, actor_params, critic_params)
    check(probs, value, ref_probs, ref_value, batch, action_size)

    # Larger batch: multi-step grid (weights stay VMEM-resident across steps,
    # grid shards across TensorCores on v7x via dimension_semantics).
    big_batch = 300
    state_big = jax.random.normal(
        k_state_big, (big_batch, state_size), jnp.float32
    )
    probs_b, value_b = actor_critic_forward(
        state_big, w_slab, b_slab, action_size=action_size
    )
    probs_b, value_b = jax.block_until_ready((probs_b, value_b))
    ref_probs_b, ref_value_b = reference_forward(
        state_big, actor_params, critic_params
    )
    check(probs_b, value_b, ref_probs_b, ref_value_b, big_batch, action_size)

    # TODO(synk): torch.distributions.Categorical has no tensor/Pallas
    # equivalent; the kernel returns the softmax probabilities that would
    # parameterize it (plus the critic value).
    print("KERNEL_OK")
</pallas_src>

<mosaic_0001>
module attributes {stable_mosaic.version = 11 : i64} {
  func.func @fused_actor_critic_kernel(%arg0: i32, %arg1: memref<128x128xf32, #tpu.memory_space<vmem>>, %arg2: memref<4x128x128xbf16, #tpu.memory_space<vmem>>, %arg3: memref<4x1x128xf32, #tpu.memory_space<vmem>>, %arg4: memref<128x128xf32, #tpu.memory_space<vmem>>) attributes {dimension_semantics = [#tpu.dimension_semantics<parallel>], iteration_bounds = array<i64: 1>, scalar_prefetch = 0 : i64, scratch_operands = 0 : i64, tpu.core_type = #tpu.core_type<tc>, window_params = [{transform_indices = @transform_0, window_bounds = array<i64: 128, 128>}, {pipeline_mode = #tpu.pipeline_mode<synchronous>, transform_indices = @transform_1, window_bounds = array<i64: 4, 128, 128>}, {pipeline_mode = #tpu.pipeline_mode<synchronous>, transform_indices = @transform_2, window_bounds = array<i64: 4, 1, 128>}, {transform_indices = @transform_3, window_bounds = array<i64: 128, 128>}]} {
    %c0 = arith.constant 0 : index
    %c0_0 = arith.constant 0 : index
    %0 = vector.load %arg1[%c0, %c0_0] : memref<128x128xf32, #tpu.memory_space<vmem>>, vector<128x128xf32>
    %1 = arith.truncf %0 : vector<128x128xf32> to vector<128x128xbf16>
    %c0_1 = arith.constant 0 : index
    %c0_2 = arith.constant 0 : index
    %c0_3 = arith.constant 0 : index
    %2 = vector.load %arg2[%c0_1, %c0_2, %c0_3] : memref<4x128x128xbf16, #tpu.memory_space<vmem>>, vector<1x128x128xbf16>
    %3 = vector.shape_cast %2 : vector<1x128x128xbf16> to vector<128x128xbf16>
    %cst = arith.constant dense<0.000000e+00> : vector<128x128xf32>
    %4 = tpu.matmul %1, %3, %cst {dimension_numbers = #tpu.dot_dimension_numbers<[1], [0], [0], [1], [0, 0, 1, 1], [], []>} : vector<128x128xbf16>, vector<128x128xbf16>, vector<128x128xf32> -> vector<128x128xf32>
    %c0_4 = arith.constant 0 : index
    %c0_5 = arith.constant 0 : index
    %c0_6 = arith.constant 0 : index
    %5 = vector.load %arg3[%c0_4, %c0_5, %c0_6] : memref<4x1x128xf32, #tpu.memory_space<vmem>>, vector<1x1x128xf32>
    %6 = vector.shape_cast %5 : vector<1x1x128xf32> to vector<1x128xf32>
    %7 = vector.broadcast %6 : vector<1x128xf32> to vector<128x128xf32>
    %8 = arith.addf %4, %7 : vector<128x128xf32>
    %cst_7 = arith.constant 0.000000e+00 : f32
    %9 = vector.broadcast %cst_7 : f32 to vector<128x128xf32>
    %10 = arith.maximumf %8, %9 : vector<128x128xf32>
    %11 = arith.truncf %10 : vector<128x128xf32> to vector<128x128xbf16>
    %c1 = arith.constant 1 : index
    %c0_8 = arith.constant 0 : index
    %c0_9 = arith.constant 0 : index
    %12 = vector.load %arg2[%c1, %c0_8, %c0_9] : memref<4x128x128xbf16, #tpu.memory_space<vmem>>, vector<1x128x128xbf16>
    %13 = vector.shape_cast %12 : vector<1x128x128xbf16> to vector<128x128xbf16>
    %cst_10 = arith.constant dense<0.000000e+00> : vector<128x128xf32>
    %14 = tpu.matmul %11, %13, %cst_10 {dimension_numbers = #tpu.dot_dimension_numbers<[1], [0], [0], [1], [0, 0, 1, 1], [], []>} : vector<128x128xbf16>, vector<128x128xbf16>, vector<128x128xf32> -> vector<128x128xf32>
    %c1_11 = arith.constant 1 : index
    %c0_12 = arith.constant 0 : index
    %c0_13 = arith.constant 0 : index
    %15 = vector.load %arg3[%c1_11, %c0_12, %c0_13] : memref<4x1x128xf32, #tpu.memory_space<vmem>>, vector<1x1x128xf32>
    %16 = vector.shape_cast %15 : vector<1x1x128xf32> to vector<1x128xf32>
    %17 = vector.broadcast %16 : vector<1x128xf32> to vector<128x128xf32>
    %18 = arith.addf %14, %17 : vector<128x128xf32>
    %cst_14 = arith.constant 0.000000e+00 : f32
    %19 = vector.broadcast %cst_14 : f32 to vector<128x128xf32>
    %20 = arith.maximumf %18, %19 : vector<128x128xf32>
    %21 = arith.truncf %20 : vector<128x128xf32> to vector<128x128xbf16>
    %c2 = arith.constant 2 : index
    %c0_15 = arith.constant 0 : index
    %c0_16 = arith.constant 0 : index
    %22 = vector.load %arg2[%c2, %c0_15, %c0_16] : memref<4x128x128xbf16, #tpu.memory_space<vmem>>, vector<1x128x128xbf16>
    %23 = vector.shape_cast %22 : vector<1x128x128xbf16> to vector<128x128xbf16>
    %cst_17 = arith.constant dense<0.000000e+00> : vector<128x128xf32>
    %24 = tpu.matmul %21, %23, %cst_17 {dimension_numbers = #tpu.dot_dimension_numbers<[1], [0], [0], [1], [0, 0, 1, 1], [], []>} : vector<128x128xbf16>, vector<128x128xbf16>, vector<128x128xf32> -> vector<128x128xf32>
    %c2_18 = arith.constant 2 : index
    %c0_19 = arith.constant 0 : index
    %c0_20 = arith.constant 0 : index
    %25 = vector.load %arg3[%c2_18, %c0_19, %c0_20] : memref<4x1x128xf32, #tpu.memory_space<vmem>>, vector<1x1x128xf32>
    %26 = vector.shape_cast %25 : vector<1x1x128xf32> to vector<1x128xf32>
    %27 = vector.broadcast %26 : vector<1x128xf32> to vector<128x128xf32>
    %28 = arith.addf %24, %27 : vector<128x128xf32>
    %cst_21 = arith.constant 0.000000e+00 : f32
    %29 = vector.broadcast %cst_21 : f32 to vector<128x128xf32>
    %30 = arith.maximumf %28, %29 : vector<128x128xf32>
    %31 = arith.truncf %30 : vector<128x128xf32> to vector<128x128xbf16>
    %c3 = arith.constant 3 : index
    %c0_22 = arith.constant 0 : index
    %c0_23 = arith.constant 0 : index
    %32 = vector.load %arg2[%c3, %c0_22, %c0_23] : memref<4x128x128xbf16, #tpu.memory_space<vmem>>, vector<1x128x128xbf16>
    %33 = vector.shape_cast %32 : vector<1x128x128xbf16> to vector<128x128xbf16>
    %cst_24 = arith.constant dense<0.000000e+00> : vector<128x128xf32>
    %34 = tpu.matmul %31, %33, %cst_24 {dimension_numbers = #tpu.dot_dimension_numbers<[1], [0], [0], [1], [0, 0, 1, 1], [], []>} : vector<128x128xbf16>, vector<128x128xbf16>, vector<128x128xf32> -> vector<128x128xf32>
    %c3_25 = arith.constant 3 : index
    %c0_26 = arith.constant 0 : index
    %c0_27 = arith.constant 0 : index
    %35 = vector.load %arg3[%c3_25, %c0_26, %c0_27] : memref<4x1x128xf32, #tpu.memory_space<vmem>>, vector<1x1x128xf32>
    %36 = vector.shape_cast %35 : vector<1x1x128xf32> to vector<1x128xf32>
    %37 = vector.broadcast %36 : vector<1x128xf32> to vector<128x128xf32>
    %38 = arith.addf %34, %37 : vector<128x128xf32>
    %39 = tpu.iota {dimensions = array<i32: 1>} : vector<128x128xi32>
    %c4_i32 = arith.constant 4 : i32
    %40 = vector.broadcast %c4_i32 : i32 to vector<128x128xi32>
    %41 = arith.cmpi slt, %39, %40 : vector<128x128xi32>
    %cst_28 = arith.constant -1.000000e+30 : f32
    %42 = vector.broadcast %cst_28 : f32 to vector<128x128xf32>
    %43 = arith.select %41, %38, %42 : vector<128x128xi1>, vector<128x128xf32>
    %cst_29 = arith.constant dense<0xFF800000> : vector<128xf32>
    %44 = vector.multi_reduction <maximumf>, %43, %cst_29 [1] : vector<128x128xf32> to vector<128xf32>
    %45 = vector.shape_cast %44 : vector<128xf32> to vector<128x1xf32>
    %46 = vector.broadcast %45 : vector<128x1xf32> to vector<128x128xf32>
    %47 = arith.subf %43, %46 : vector<128x128xf32>
    %48 = math.exp %47 : vector<128x128xf32>
    %cst_30 = arith.constant dense<0.000000e+00> : vector<128xf32>
    %49 = vector.multi_reduction <add>, %48, %cst_30 [1] : vector<128x128xf32> to vector<128xf32>
    %50 = vector.shape_cast %49 : vector<128xf32> to vector<128x1xf32>
    %51 = vector.broadcast %50 : vector<128x1xf32> to vector<128x128xf32>
    %52 = arith.divf %48, %51 : vector<128x128xf32>
    %c4_i32_31 = arith.constant 4 : i32
    %53 = vector.broadcast %c4_i32_31 : i32 to vector<128x128xi32>
    %54 = arith.cmpi eq, %39, %53 : vector<128x128xi32>
    %55 = arith.select %54, %38, %52 : vector<128x128xi1>, vector<128x128xf32>
    %c0_32 = arith.constant 0 : index
    %c0_33 = arith.constant 0 : index
    %56 = vector.load %arg4[%c0_32, %c0_33] : memref<128x128xf32, #tpu.memory_space<vmem>>, vector<128x128xf32>
    tpu.vector_store %arg4[%c0_32, %c0_33], %55 {strides = array<i32>} : memref<128x128xf32, #tpu.memory_space<vmem>>, vector<128x128xf32>,
    return
  }
  func.func @transform_0(%arg0: i32) -> (i32, i32) {
    %c0_i32 = arith.constant 0 : i32
    %c0_i32_0 = arith.constant 0 : i32
    return %arg0, %c0_i32 : i32, i32
  }
  func.func @transform_1(%arg0: i32) -> (i32, i32, i32) {
    %c0_i32 = arith.constant 0 : i32
    %c0_i32_0 = arith.constant 0 : i32
    %c0_i32_1 = arith.constant 0 : i32
    %c0_i32_2 = arith.constant 0 : i32
    return %c0_i32, %c0_i32_0, %c0_i32_1 : i32, i32, i32
  }
  func.func @transform_2(%arg0: i32) -> (i32, i32, i32) {
    %c0_i32 = arith.constant 0 : i32
    %c0_i32_0 = arith.constant 0 : i32
    %c0_i32_1 = arith.constant 0 : i32
    %c0_i32_2 = arith.constant 0 : i32
    return %c0_i32, %c0_i32_0, %c0_i32_1 : i32, i32, i32
  }
  func.func @transform_3(%arg0: i32) -> (i32, i32) {
    %c0_i32 = arith.constant 0 : i32
    %c0_i32_0 = arith.constant 0 : i32
    return %arg0, %c0_i32 : i32, i32
  }
}

</mosaic_0001>

<bundles_post_ra>
// kernel: actor_critic_forward.1
= control target key start
LH: loop header
LB: loop body
LE: loop exit
PB: predicated region body
PF: predicated region fallthrough
CT: control target
= control target key end

     0   :  { %8 = vsyncpa [#allocation3], 0  ;;  %s1356_s12 = smov [#allocation2]   ;;  %s1730_s0 = inlined_call_operand.vmem [shape: f32[128,128], index: 0, kind: input, shape index: {}]   ;;  %s1731_s1 = inlined_call_operand.hbm [shape: bf16[4,128,128], index: 1, kind: input, shape index: {}]   ;;  %s1732_s2 = inlined_call_operand.vmem [shape: f32[4,1,128], index: 2, kind: input, shape index: {}]   ;;  %s1733_s3 = inlined_call_operand.vmem [shape: f32[128,128], index: 3, kind: output, shape index: {}]  }
   0x1   :  { %s16_s13 = sshll.u32 %s1356_s12, 4  ;;  %s17_s13 = int_to_ptr.vmem [resolvable:$true] %s16_s13 }
   0x2   :  { %s1342_s14 = scalar_lea.vmem %s17_s13, 4096  ;;  %p1347_p1 = scmp.lt.s32.totalorder %s17_s13, %s17_s13 }
   0x3   :  { %p1343_p0 = scmp.ne.s32.totalorder %s17_s13, %s1342_s14  ;;  %p1348_p2 = scmp.lt.s32.totalorder %s1342_s14, %s1342_s14 }
   0x5   :  { %p1349_p3 = por %p1348_p2, %p1347_p1 }
   0x7   :  { %p1350_p4 = pnand %p1349_p3, %p1343_p0 }
   0x9   :  { %1353 = shalt.err (!%p1350_p4)
}
   0xa   :  { %s1357_s15 = smov 64   ;;  %s1358_s16 = smov 4  }
   0xb   :  { %22 = dma.hbm_to_vmem [thread:$0]  %s1731_s1, 4096, %s17_s13, [#allocation3], %s1357_s15, %s1357_s15, %s1358_s16  }
   0xc   :  { %1354 = dma.done.wait [#allocation3], 4096  }
   0xd   :  { %1355 = vsyncadd [#allocation3], 4294963200  ;;  %v1238_v0 = vld [vmem:[#allocation2 + $0x38] sm:$0xff]   ;;  %v1239_v1 = vld [vmem:[#allocation2 + $0x30] sm:$0xff]  }
   0xe   :  { %1107 = vmatprep.subr.bf16.mxu0 %v1238_v0  ;;  %v1240_v2 = vld [vmem:[#allocation2 + $0x28] sm:$0xff]   ;;  %v1241_v3 = vld [vmem:[#allocation2 + $0x20] sm:$0xff]   ;;  %v1242_v7 = vld [vmem:[#allocation2 + $0x18] sm:$0xff]  }
   0xf   :  { %1108 = vmatpush3.bf16.msra.mxu0 %v1238_v0  ;;  %v29_v4 = vld [vmem:[%s1730_s0] sm:$0xff]  ;;  %v30_v5 = vld [vmem:[%s1730_s0 + $0x8] sm:$0xff]  ;;  %v1246_v8 = vld [vmem:[#allocation2 + $0x78] sm:$0xff]  }
  0x10   :  { %1109 = vmatprep.subr.bf16.mxu0 %v1239_v1  ;;  %v45_v6 = vpack.c.bf16 %v30_v5, %v29_v4  ;;  %v1247_v9 = vld [vmem:[#allocation2 + $0x70] sm:$0xff]   ;;  %1139 = vmatprep.subr.bf16.mxu1 %v1246_v8  ;;  %v1244_v11 = vld [vmem:[#allocation2 + $0x8] sm:$0xff]   ;;  %v1249_v13 = vld [vmem:[#allocation2 + $0x60] sm:$0xff]  }
  0x11   :  { %v1243_v10 = vld [vmem:[#allocation2 + $0x10] sm:$0xff]   ;;  %1140 = vmatpush3.bf16.msra.mxu1 %v1246_v8  ;;  %v1248_v12 = vld [vmem:[#allocation2 + $0x68] sm:$0xff]   ;;  %v1245_v14 = vld [vmem:[#allocation2] sm:$0xff]  }
  0x12   :  { %1123 = vmatprep.mubr.bf16.mxu0 %v45_v6  ;;  %1141 = vmatprep.subr.bf16.mxu1 %v1247_v9  ;;  %v1250_v15 = vld [vmem:[#allocation2 + $0x58] sm:$0xff]   ;;  %v31_v16 = vld [vmem:[%s1730_s0 + $0x10] sm:$0xff]  ;;  %v33_v18 = vld [vmem:[%s1730_s0 + $0x20] sm:$0xff] }
  0x13   :  { %1110 = vmatpush3.bf16.msra.mxu0 %v1239_v1  ;;  %v32_v17 = vld [vmem:[%s1730_s0 + $0x18] sm:$0xff]  ;;  %v34_v19 = vld [vmem:[%s1730_s0 + $0x28] sm:$0xff]  ;;  %v35_v22 = vld [vmem:[%s1730_s0 + $0x30] sm:$0xff] }
  0x14   :  { %1111 = vmatprep.subr.bf16.mxu0 %v1240_v2  ;;  %v46_v20 = vpack.c.bf16 %v32_v17, %v31_v16  ;;  %v47_v21 = vpack.c.bf16 %v34_v19, %v33_v18  ;;  %v36_v23 = vld [vmem:[%s1730_s0 + $0x38] sm:$0xff]  ;;  %v37_v24 = vld [vmem:[%s1730_s0 + $0x40] sm:$0xff]  ;;  %v38_v25 = vld [vmem:[%s1730_s0 + $0x48] sm:$0xff] }
  0x15   :  { %1142 = vmatpush3.bf16.msra.mxu1 %v1247_v9  ;;  %v48_v26 = vpack.c.bf16 %v36_v23, %v35_v22  ;;  %v49_v27 = vpack.c.bf16 %v38_v25, %v37_v24  ;;  %v39_v28 = vld [vmem:[%s1730_s0 + $0x50] sm:$0xff]  ;;  %v40_v29 = vld [vmem:[%s1730_s0 + $0x58] sm:$0xff]  ;;  %v41_v30 = vld [vmem:[%s1730_s0 + $0x60] sm:$0xff] }
  0x16   :  { %1143 = vmatprep.subr.bf16.mxu1 %v1248_v12  ;;  %v42_v31 = vld [vmem:[%s1730_s0 + $0x68] sm:$0xff]  ;;  %v50_v32 = vpack.c.bf16 %v40_v29, %v39_v28  ;;  %v43_v34 = vld [vmem:[%s1730_s0 + $0x70] sm:$0xff]  ;;  %v44_v35 = vld [vmem:[%s1730_s0 + $0x78] sm:$0xff] }
  0x17   :  { %1112 = vmatpush3.bf16.msra.mxu0 %v1240_v2  ;;  %v51_v33 = vpack.c.bf16 %v42_v31, %v41_v30  ;;  %v52_v36 = vpack.c.bf16 %v44_v35, %v43_v34  ;;  %v1251_v37 = vld [vmem:[#allocation2 + $0x50] sm:$0xff]   ;;  %v1252_v38 = vld [vmem:[#allocation2 + $0x48] sm:$0xff]   ;;  %v1253_v39 = vld [vmem:[#allocation2 + $0x40] sm:$0xff]  }
  0x18   :  { %1113 = vmatprep.subr.bf16.mxu0 %v1241_v3  ;;  %v1254_v40 = vld [vmem:[#allocation2 + $0xb8] sm:$0xff]   ;;  %v1255_v41 = vld [vmem:[#allocation2 + $0xb0] sm:$0xff]   ;;  %v1256_v42 = vld [vmem:[#allocation2 + $0xa8] sm:$0xff]  }
  0x19   :  { %1144 = vmatpush3.bf16.msra.mxu1 %v1248_v12  ;;  %v1257_v43 = vld [vmem:[#allocation2 + $0xa0] sm:$0xff]   ;;  %v1258_v44 = vld [vmem:[#allocation2 + $0x98] sm:$0xff]  }
  0x1a   :  { %1145 = vmatprep.subr.bf16.mxu1 %v1249_v13  ;;  %v1004_v47 = vld [vmem:[%s1732_s2] ss:$0 sm:$0xff] }
  0x1b   :  { %1114 = vmatpush3.bf16.msra.mxu0 %v1241_v3 }
  0x1c   :  { %1115 = vmatprep.subr.bf16.mxu0 %v1242_v7 }
  0x1d   :  { %1146 = vmatpush3.bf16.msra.mxu1 %v1249_v13 }
  0x1e   :  { %1147 = vmatprep.subr.bf16.mxu1 %v1250_v15 }
  0x1f   :  { %1116 = vmatpush3.bf16.msra.mxu0 %v1242_v7 }
  0x20   :  { %1117 = vmatprep.subr.bf16.mxu0 %v1243_v10 }
  0x21   :  { %1148 = vmatpush3.bf16.msra.mxu1 %v1250_v15 }
  0x22   :  { %1149 = vmatprep.subr.bf16.mxu1 %v1251_v37 }
  0x23   :  { %1118 = vmatpush3.bf16.msra.mxu0 %v1243_v10 }
  0x24   :  { %1119 = vmatprep.subr.bf16.mxu0 %v1244_v11 }
  0x25   :  { %1150 = vmatpush3.bf16.msra.mxu1 %v1251_v37 }
  0x26   :  { %1151 = vmatprep.subr.bf16.mxu1 %v1252_v38 }
  0x27   :  { %1120 = vmatpush3.bf16.msra.mxu0 %v1244_v11 }
  0x28   :  { %1121 = vmatprep.subr.bf16.mxu0 %v1245_v14 }
  0x29   :  { %1152 = vmatpush3.bf16.msra.mxu1 %v1252_v38  ;;  %v1259_v38 = vld [vmem:[#allocation2 + $0x90] sm:$0xff]  }
  0x2a   :  { %1153 = vmatprep.subr.bf16.mxu1 %v1253_v39 }
  0x2b   :  { %1122 = vmatpush3.bf16.msra.mxu0 %v1245_v14 }
  0x2c   :  { %1171 = vmatprep.subr.bf16.mxu0 %v1254_v40 }
  0x2d   :  { %1154 = vmatpush3.bf16.msra.mxu1 %v1253_v39  ;;  %v1260_v39 = vld [vmem:[#allocation2 + $0x88] sm:$0xff]  }
  0x2e   :  { %1124 = vmatmul.mubr.bf16.vlgmr.msra.gmra.mxu0 %v46_v20 }
  0x2f   :  { %1127 = vmatprep.mubr.bf16.mxu0 %v47_v21  ;;  %1172 = vmatpush3.bf16.msra.mxu0 %v1254_v40  ;;  %v1261_v40 = vld [vmem:[#allocation2 + $0x80] sm:$0xff]  }
  0x30   :  { %1173 = vmatprep.subr.bf16.mxu0 %v1255_v41 }
  0x33   :  { %1174 = vmatpush3.bf16.msra.mxu0 %v1255_v41  ;;  %v1262_v41 = vld [vmem:[#allocation2 + $0xf8] sm:$0xff]  }
  0x34   :  { %1175 = vmatprep.subr.bf16.mxu0 %v1256_v42  ;;  %1203 = vmatprep.subr.bf16.mxu1 %v1262_v41 }
  0x36   :  { %1128 = vmatmul.mubr.bf16.gmra.mxu0 %v48_v26 }
  0x37   :  { %1131 = vmatprep.mubr.bf16.mxu0 %v49_v27  ;;  %1176 = vmatpush3.bf16.msra.mxu0 %v1256_v42  ;;  %v1263_v42 = vld [vmem:[#allocation2 + $0xf0] sm:$0xff]  }
  0x38   :  { %1177 = vmatprep.subr.bf16.mxu0 %v1257_v43 }
  0x3b   :  { %1178 = vmatpush3.bf16.msra.mxu0 %v1257_v43  ;;  %v1264_v43 = vld [vmem:[#allocation2 + $0xe8] sm:$0xff]  }
  0x3c   :  { %1179 = vmatprep.subr.bf16.mxu0 %v1258_v44 }
  0x3e   :  { %1132 = vmatmul.mubr.bf16.gmra.mxu0 %v50_v32 }
  0x3f   :  { %1135 = vmatprep.mubr.bf16.mxu0 %v51_v33  ;;  %1180 = vmatpush3.bf16.msra.mxu0 %v1258_v44  ;;  %v1265_v44 = vld [vmem:[#allocation2 + $0xe0] sm:$0xff]  }
  0x40   :  { %1181 = vmatprep.subr.bf16.mxu0 %v1259_v38 }
  0x43   :  { %1182 = vmatpush3.bf16.msra.mxu0 %v1259_v38 }
  0x44   :  { %1183 = vmatprep.subr.bf16.mxu0 %v1260_v39 }
  0x46   :  { %1136 = vmatmul.mubr.bf16.gmra.mxu0 %v52_v36 }
  0x47   :  { %1184 = vmatpush3.bf16.msra.mxu0 %v1260_v39  ;;  %v1267_v39 = vld [vmem:[#allocation2 + $0xd0] sm:$0xff]  }
  0x48   :  { %1185 = vmatprep.subr.bf16.mxu0 %v1261_v40 }
  0x4b   :  { %1186 = vmatpush3.bf16.msra.mxu0 %v1261_v40  ;;  %v1268_v40 = vld [vmem:[#allocation2 + $0xc8] sm:$0xff]  }
  0xee   :  { %v1125_v45 = vpop.f32.mrf.mxu0 }
  0xef   :  { %v167_v51 = vadd.f32 %v1125_v45, %v1004_v47  ;;  %v1266_v45 = vld [vmem:[#allocation2 + $0xd8] sm:$0xff]  }
  0xf0   :  { %v158_v46 = vpop.f32.mrf.mxu0 }
  0xf1   :  { %v159_v49 = vadd.f32 %v1004_v47, %v158_v46  ;;  %v223_v58 = vmax.f32 %v167_v51, 0.0 }
  0xf2   :  { %v1126_v48 = vpop.f32.mrf.mxu0 }
  0xf3   :  { %v170_v50 = vadd.f32 %v1126_v48, %v1004_v47  ;;  %v221_v56 = vmax.f32 %v159_v49, 0.0  ;;  %v1014_v48 = vld [vmem:[%s1732_s2 + $0x1] ss:$0 sm:$0xff] }
  0xf4   :  { %v161_v52 = vpop.f32.mrf.mxu0 }
  0xf5   :  { %v162_v53 = vadd.f32 %v1004_v47, %v161_v52  ;;  %v224_v54 = vmax.f32 %v170_v50, 0.0 }
  0xf6   :  { %v1129_v55 = vpop.f32.mrf.mxu0 }
  0xf7   :  { %v222_v57 = vmax.f32 %v162_v53, 0.0  ;;  %v238_v61 = vpack.c.bf16 %v224_v54, %v223_v58  ;;  %v183_v1 = vadd.f32 %v1129_v55, %v1004_v47 }
  0xf8   :  { %v174_v59 = vpop.f32.mrf.mxu0 }
  0xf9   :  { %v237_v60 = vpack.c.bf16 %v222_v57, %v221_v56  ;;  %v175_v63 = vadd.f32 %v1004_v47, %v174_v59  ;;  %v227_v8 = vmax.f32 %v183_v1, 0.0 }
  0xfa   :  { %v1130_v62 = vpop.f32.mrf.mxu0 }
  0xfb   :  { %v186_v0 = vadd.f32 %v1130_v62, %v1004_v47  ;;  %1155 = vmatprep.mubr.bf16.mxu1 %v237_v60  ;;  %v225_v6 = vmax.f32 %v175_v63, 0.0 }
  0xfc   :  { %v177_v2 = vpop.f32.mrf.mxu0  ;;  %1156 = vmatmul.mubr.bf16.vlgmr.msra.gmra.mxu1 %v238_v61 }
  0xfd   :  { %v178_v3 = vadd.f32 %v1004_v47, %v177_v2  ;;  %v228_v4 = vmax.f32 %v186_v0, 0.0  ;;  %1204 = vmatpush3.bf16.msra.mxu1 %v1262_v41  ;;  %v1269_v41 = vld [vmem:[#allocation2 + $0xc0] sm:$0xff]  }
  0xfe   :  { %v1133_v5 = vpop.f32.mrf.mxu0  ;;  %1205 = vmatprep.subr.bf16.mxu1 %v1263_v42 }
  0xff   :  { %v226_v7 = vmax.f32 %v178_v3, 0.0  ;;  %v240_v11 = vpack.c.bf16 %v228_v4, %v227_v8  ;;  %v199_v15 = vadd.f32 %v1133_v5, %v1004_v47 }
 0x100   :  { %v190_v9 = vpop.f32.mrf.mxu0 }
 0x101   :  { %v239_v10 = vpack.c.bf16 %v226_v7, %v225_v6  ;;  %v191_v13 = vadd.f32 %v1004_v47, %v190_v9  ;;  %v231_v22 = vmax.f32 %v199_v15, 0.0  ;;  %1206 = vmatpush3.bf16.msra.mxu1 %v1263_v42 }
 0x102   :  { %v1134_v12 = vpop.f32.mrf.mxu0  ;;  %1207 = vmatprep.subr.bf16.mxu1 %v1264_v43 }
 0x103   :  { %v202_v14 = vadd.f32 %v1134_v12, %v1004_v47  ;;  %1159 = vmatprep.mubr.bf16.mxu1 %v239_v10  ;;  %v229_v20 = vmax.f32 %v191_v13, 0.0 }
 0x104   :  { %v193_v16 = vpop.f32.mrf.mxu0  ;;  %1160 = vmatmul.mubr.bf16.gmra.mxu1 %v240_v11 }
 0x105   :  { %v194_v17 = vadd.f32 %v1004_v47, %v193_v16  ;;  %v232_v18 = vmax.f32 %v202_v14, 0.0  ;;  %1208 = vmatpush3.bf16.msra.mxu1 %v1264_v43 }
 0x106   :  { %v1137_v19 = vpop.f32.mrf.mxu0  ;;  %1209 = vmatprep.subr.bf16.mxu1 %v1265_v44 }
 0x107   :  { %v230_v21 = vmax.f32 %v194_v17, 0.0  ;;  %v242_v25 = vpack.c.bf16 %v232_v18, %v231_v22  ;;  %v215_v29 = vadd.f32 %v1137_v19, %v1004_v47 }
 0x108   :  { %v206_v23 = vpop.f32.mrf.mxu0 }
 0x109   :  { %v241_v24 = vpack.c.bf16 %v230_v21, %v229_v20  ;;  %v207_v27 = vadd.f32 %v1004_v47, %v206_v23  ;;  %v235_v35 = vmax.f32 %v215_v29, 0.0  ;;  %1210 = vmatpush3.bf16.msra.mxu1 %v1265_v44  ;;  %v1024_v44 = vld [vmem:[%s1732_s2 + $0x2] ss:$0 sm:$0xff] }
 0x10a   :  { %v1138_v26 = vpop.f32.mrf.mxu0  ;;  %1211 = vmatprep.subr.bf16.mxu1 %v1266_v45 }
 0x10b   :  { %v218_v28 = vadd.f32 %v1138_v26, %v1004_v47  ;;  %1163 = vmatprep.mubr.bf16.mxu1 %v241_v24  ;;  %v233_v33 = vmax.f32 %v207_v27, 0.0 }
 0x10c   :  { %v209_v30 = vpop.f32.mrf.mxu0  ;;  %1164 = vmatmul.mubr.bf16.gmra.mxu1 %v242_v25 }
 0x10d   :  { %v210_v31 = vadd.f32 %v1004_v47, %v209_v30  ;;  %v236_v32 = vmax.f32 %v218_v28, 0.0  ;;  %1212 = vmatpush3.bf16.msra.mxu1 %v1266_v45 }
 0x10e   :  { %1213 = vmatprep.subr.bf16.mxu1 %v1267_v39 }
 0x10f   :  { %v234_v34 = vmax.f32 %v210_v31, 0.0  ;;  %v244_v37 = vpack.c.bf16 %v236_v32, %v235_v35 }
 0x111   :  { %v243_v36 = vpack.c.bf16 %v234_v34, %v233_v33  ;;  %1214 = vmatpush3.bf16.msra.mxu1 %v1267_v39 }
 0x112   :  { %1215 = vmatprep.subr.bf16.mxu1 %v1268_v40 }
 0x113   :  { %1167 = vmatprep.mubr.bf16.mxu1 %v243_v36 }
 0x114   :  { %1168 = vmatmul.mubr.bf16.gmra.mxu1 %v244_v37 }
 0x115   :  { %1216 = vmatpush3.bf16.msra.mxu1 %v1268_v40 }
 0x116   :  { %1217 = vmatprep.subr.bf16.mxu1 %v1269_v41 }
 0x119   :  { %1218 = vmatpush3.bf16.msra.mxu1 %v1269_v41 }
 0x1bc   :  { %v1157_v46 = vpop.f32.mrf.mxu1 }
 0x1bd   :  { %v361_v52 = vadd.f32 %v1157_v46, %v1014_v48 }
 0x1be   :  { %v352_v47 = vpop.f32.mrf.mxu1 }
 0x1bf   :  { %v353_v50 = vadd.f32 %v1014_v48, %v352_v47  ;;  %v417_v59 = vmax.f32 %v361_v52, 0.0 }
 0x1c0   :  { %v1158_v49 = vpop.f32.mrf.mxu1 }
 0x1c1   :  { %v364_v51 = vadd.f32 %v1158_v49, %v1014_v48  ;;  %v415_v57 = vmax.f32 %v353_v50, 0.0 }
 0x1c2   :  { %v355_v53 = vpop.f32.mrf.mxu1 }
 0x1c3   :  { %v356_v54 = vadd.f32 %v1014_v48, %v355_v53  ;;  %v418_v55 = vmax.f32 %v364_v51, 0.0 }
 0x1c4   :  { %v1161_v56 = vpop.f32.mrf.mxu1 }
 0x1c5   :  { %v416_v58 = vmax.f32 %v356_v54, 0.0  ;;  %v432_v62 = vpack.c.bf16 %v418_v55, %v417_v59  ;;  %v377_v2 = vadd.f32 %v1161_v56, %v1014_v48 }
 0x1c6   :  { %v368_v60 = vpop.f32.mrf.mxu1 }
 0x1c7   :  { %v431_v61 = vpack.c.bf16 %v416_v58, %v415_v57  ;;  %v369_v0 = vadd.f32 %v1014_v48, %v368_v60  ;;  %v421_v9 = vmax.f32 %v377_v2, 0.0 }
 0x1c8   :  { %v1162_v63 = vpop.f32.mrf.mxu1 }
 0x1c9   :  { %v380_v1 = vadd.f32 %v1162_v63, %v1014_v48  ;;  %1187 = vmatprep.mubr.bf16.mxu0 %v431_v61  ;;  %v419_v7 = vmax.f32 %v369_v0, 0.0 }
 0x1ca   :  { %v371_v3 = vpop.f32.mrf.mxu1  ;;  %1188 = vmatmul.mubr.bf16.vlgmr.msra.gmra.mxu0 %v432_v62 }
 0x1cb   :  { %v372_v4 = vadd.f32 %v1014_v48, %v371_v3  ;;  %v422_v5 = vmax.f32 %v380_v1, 0.0 }
 0x1cc   :  { %v1165_v6 = vpop.f32.mrf.mxu1 }
 0x1cd   :  { %v420_v8 = vmax.f32 %v372_v4, 0.0  ;;  %v434_v12 = vpack.c.bf16 %v422_v5, %v421_v9  ;;  %v393_v16 = vadd.f32 %v1165_v6, %v1014_v48 }
 0x1ce   :  { %v384_v10 = vpop.f32.mrf.mxu1 }
 0x1cf   :  { %v433_v11 = vpack.c.bf16 %v420_v8, %v419_v7  ;;  %v385_v14 = vadd.f32 %v1014_v48, %v384_v10  ;;  %v425_v23 = vmax.f32 %v393_v16, 0.0 }
 0x1d0   :  { %v1166_v13 = vpop.f32.mrf.mxu1 }
 0x1d1   :  { %v396_v15 = vadd.f32 %v1166_v13, %v1014_v48  ;;  %1191 = vmatprep.mubr.bf16.mxu0 %v433_v11  ;;  %v423_v21 = vmax.f32 %v385_v14, 0.0 }
 0x1d2   :  { %v387_v17 = vpop.f32.mrf.mxu1  ;;  %1192 = vmatmul.mubr.bf16.gmra.mxu0 %v434_v12 }
 0x1d3   :  { %v388_v18 = vadd.f32 %v1014_v48, %v387_v17  ;;  %v426_v19 = vmax.f32 %v396_v15, 0.0 }
 0x1d4   :  { %v1169_v20 = vpop.f32.mrf.mxu1 }
 0x1d5   :  { %v424_v22 = vmax.f32 %v388_v18, 0.0  ;;  %v436_v26 = vpack.c.bf16 %v426_v19, %v425_v23  ;;  %v409_v30 = vadd.f32 %v1169_v20, %v1014_v48 }
 0x1d6   :  { %v400_v24 = vpop.f32.mrf.mxu1 }
 0x1d7   :  { %v435_v25 = vpack.c.bf16 %v424_v22, %v423_v21  ;;  %v401_v28 = vadd.f32 %v1014_v48, %v400_v24  ;;  %v429_v36 = vmax.f32 %v409_v30, 0.0 }
 0x1d8   :  { %v1170_v27 = vpop.f32.mrf.mxu1 }
 0x1d9   :  { %v412_v29 = vadd.f32 %v1170_v27, %v1014_v48  ;;  %1195 = vmatprep.mubr.bf16.mxu0 %v435_v25  ;;  %v427_v34 = vmax.f32 %v401_v28, 0.0 }
 0x1da   :  { %v403_v31 = vpop.f32.mrf.mxu1  ;;  %1196 = vmatmul.mubr.bf16.gmra.mxu0 %v436_v26 }
 0x1db   :  { %v404_v32 = vadd.f32 %v1014_v48, %v403_v31  ;;  %v430_v33 = vmax.f32 %v412_v29, 0.0 }
 0x1dd   :  { %v428_v35 = vmax.f32 %v404_v32, 0.0  ;;  %v438_v38 = vpack.c.bf16 %v430_v33, %v429_v36 }
 0x1df   :  { %v437_v37 = vpack.c.bf16 %v428_v35, %v427_v34  ;;  %v803_v35 = vlaneseq }
 0x1e1   :  { %1199 = vmatprep.mubr.bf16.mxu0 %v437_v37  ;;  %v1439_v36 = vand.u32 127, %v803_v35  ;;  %v1034_v37 = vld [vmem:[%s1732_s2 + $0x3] ss:$0 sm:$0xff] }
 0x1e2   :  { %1200 = vmatmul.mubr.bf16.gmra.mxu0 %v438_v38 }
 0x1e3   :  { %vm805_vm0 = vcmp.lt.s32.totalorder %v1439_v36, 4  ;;  %vm966_vm1 = vcmp.eq.s32.totalorder %v1439_v36, 4 }
 0x28a   :  { %v1189_v42 = vpop.f32.mrf.mxu0 }
 0x28b   :  { %v555_v48 = vadd.f32 %v1189_v42, %v1024_v44 }
 0x28c   :  { %v546_v43 = vpop.f32.mrf.mxu0 }
 0x28d   :  { %v547_v46 = vadd.f32 %v1024_v44, %v546_v43  ;;  %v611_v55 = vmax.f32 %v555_v48, 0.0 }
 0x28e   :  { %v1190_v45 = vpop.f32.mrf.mxu0 }
 0x28f   :  { %v558_v47 = vadd.f32 %v1190_v45, %v1024_v44  ;;  %v609_v53 = vmax.f32 %v547_v46, 0.0 }
 0x290   :  { %v549_v49 = vpop.f32.mrf.mxu0 }
 0x291   :  { %v550_v50 = vadd.f32 %v1024_v44, %v549_v49  ;;  %v612_v51 = vmax.f32 %v558_v47, 0.0 }
 0x292   :  { %v1193_v52 = vpop.f32.mrf.mxu0 }
 0x293   :  { %v610_v54 = vmax.f32 %v550_v50, 0.0  ;;  %v626_v58 = vpack.c.bf16 %v612_v51, %v611_v55  ;;  %v571_v62 = vadd.f32 %v1193_v52, %v1024_v44 }
 0x294   :  { %v562_v56 = vpop.f32.mrf.mxu0 }
 0x295   :  { %v625_v57 = vpack.c.bf16 %v610_v54, %v609_v53  ;;  %v563_v60 = vadd.f32 %v1024_v44, %v562_v56  ;;  %v615_v5 = vmax.f32 %v571_v62, 0.0 }
 0x296   :  { %v1194_v59 = vpop.f32.mrf.mxu0 }
 0x297   :  { %v574_v61 = vadd.f32 %v1194_v59, %v1024_v44  ;;  %1219 = vmatprep.mubr.bf16.mxu1 %v625_v57  ;;  %v613_v3 = vmax.f32 %v563_v60, 0.0 }
 0x298   :  { %v565_v63 = vpop.f32.mrf.mxu0  ;;  %1220 = vmatmul.mubr.bf16.vlgmr.msra.gmra.mxu1 %v626_v58 }
 0x299   :  { %v566_v0 = vadd.f32 %v1024_v44, %v565_v63  ;;  %v616_v1 = vmax.f32 %v574_v61, 0.0 }
 0x29a   :  { %v1197_v2 = vpop.f32.mrf.mxu0 }
 0x29b   :  { %v614_v4 = vmax.f32 %v566_v0, 0.0  ;;  %v628_v8 = vpack.c.bf16 %v616_v1, %v615_v5  ;;  %v587_v12 = vadd.f32 %v1197_v2, %v1024_v44 }
 0x29c   :  { %v578_v6 = vpop.f32.mrf.mxu0 }
 0x29d   :  { %v627_v7 = vpack.c.bf16 %v614_v4, %v613_v3  ;;  %v579_v10 = vadd.f32 %v1024_v44, %v578_v6  ;;  %v619_v19 = vmax.f32 %v587_v12, 0.0 }
 0x29e   :  { %v1198_v9 = vpop.f32.mrf.mxu0 }
 0x29f   :  { %v590_v11 = vadd.f32 %v1198_v9, %v1024_v44  ;;  %1223 = vmatprep.mubr.bf16.mxu1 %v627_v7  ;;  %v617_v17 = vmax.f32 %v579_v10, 0.0 }
 0x2a0   :  { %v581_v13 = vpop.f32.mrf.mxu0  ;;  %1224 = vmatmul.mubr.bf16.gmra.mxu1 %v628_v8 }
 0x2a1   :  { %v582_v14 = vadd.f32 %v1024_v44, %v581_v13  ;;  %v620_v15 = vmax.f32 %v590_v11, 0.0 }
 0x2a2   :  { %v1201_v16 = vpop.f32.mrf.mxu0 }
 0x2a3   :  { %v618_v18 = vmax.f32 %v582_v14, 0.0  ;;  %v630_v22 = vpack.c.bf16 %v620_v15, %v619_v19  ;;  %v603_v26 = vadd.f32 %v1201_v16, %v1024_v44 }
 0x2a4   :  { %v594_v20 = vpop.f32.mrf.mxu0 }
 0x2a5   :  { %v629_v21 = vpack.c.bf16 %v618_v18, %v617_v17  ;;  %v595_v24 = vadd.f32 %v1024_v44, %v594_v20  ;;  %v623_v32 = vmax.f32 %v603_v26, 0.0 }
 0x2a6   :  { %v1202_v23 = vpop.f32.mrf.mxu0 }
 0x2a7   :  { %v606_v25 = vadd.f32 %v1202_v23, %v1024_v44  ;;  %1227 = vmatprep.mubr.bf16.mxu1 %v629_v21  ;;  %v621_v30 = vmax.f32 %v595_v24, 0.0 }
 0x2a8   :  { %v597_v27 = vpop.f32.mrf.mxu0  ;;  %1228 = vmatmul.mubr.bf16.gmra.mxu1 %v630_v22 }
 0x2a9   :  { %v598_v28 = vadd.f32 %v1024_v44, %v597_v27  ;;  %v624_v29 = vmax.f32 %v606_v25, 0.0 }
 0x2ab   :  { %v622_v31 = vmax.f32 %v598_v28, 0.0  ;;  %v632_v34 = vpack.c.bf16 %v624_v29, %v623_v32 }
 0x2ad   :  { %v631_v33 = vpack.c.bf16 %v622_v31, %v621_v30 }
 0x2af   :  { %1231 = vmatprep.mubr.bf16.mxu1 %v631_v33 }
 0x2b0   :  { %1232 = vmatmul.mubr.bf16.gmra.mxu1 %v632_v34 }
 0x358   :  { %v1221_v38 = vpop.f32.mrf.mxu1 }
 0x359   :  { %v1445_v39 = vadd.f32 %v1221_v38, %v1034_v37 }
 0x35a   :  { %v740_v40 = vpop.f32.mrf.mxu1 }
 0x35b   :  { %v1447_v41 = vadd.f32 %v1034_v37, %v740_v40  ;;  %v1452_v42 = vsel %vm805_vm0, %v1445_v39, -1e+30 }
 0x35c   :  { %826 = vmax.xlane.f32.xlu1 %v1452_v42  ;;  %v1222_v43 = vpop.f32.mrf.mxu1 }
 0x35d   :  { %v1455_v44 = vadd.f32 %v1222_v43, %v1034_v37  ;;  %v1460_v45 = vsel %vm805_vm0, %v1447_v41, -1e+30 }
 0x35e   :  { %v743_v46 = vpop.f32.mrf.mxu1  ;;  %822 = vmax.xlane.f32.xlu0 %v1460_v45 }
 0x35f   :  { %v1463_v47 = vadd.f32 %v1034_v37, %v743_v46  ;;  %v809_v48 = vsel %vm805_vm0, %v1455_v44, -1e+30 }
 0x360   :  { %828 = vmax.xlane.f32.xlu1 %v809_v48  ;;  %v1225_v49 = vpop.f32.mrf.mxu1 }
 0x361   :  { %v1468_v50 = vadd.f32 %v1225_v49, %v1034_v37  ;;  %v807_v51 = vsel %vm805_vm0, %v1463_v47, -1e+30 }
 0x362   :  { %v756_v52 = vpop.f32.mrf.mxu1  ;;  %824 = vmax.xlane.f32.xlu0 %v807_v51 }
 0x363   :  { %v1473_v54 = vadd.f32 %v1034_v37, %v756_v52  ;;  %v812_v56 = vsel %vm805_vm0, %v1468_v50, -1e+30 }
 0x364   :  { %v1226_v53 = vpop.f32.mrf.mxu1 }
 0x365   :  { %v1475_v55 = vadd.f32 %v1226_v53, %v1034_v37  ;;  %v810_v62 = vsel %vm805_vm0, %v1473_v54, -1e+30 }
 0x366   :  { %v759_v57 = vpop.f32.mrf.mxu1  ;;  %834 = vmax.xlane.f32.xlu0 %v812_v56 }
 0x367   :  { %v1480_v58 = vadd.f32 %v1034_v37, %v759_v57  ;;  %v813_v59 = vsel %vm805_vm0, %v1475_v55, -1e+30 }
 0x368   :  { %836 = vmax.xlane.f32.xlu1 %v813_v59  ;;  %v1229_v60 = vpop.f32.mrf.mxu1 }
 0x369   :  { %v1485_v61 = vadd.f32 %v1229_v60, %v1034_v37  ;;  %v1493_v0 = vsel %vm805_vm0, %v1480_v58, -1e+30 }
 0x36a   :  { %v772_v63 = vpop.f32.mrf.mxu1  ;;  %830 = vmax.xlane.f32.xlu0 %v810_v62 }
 0x36b   :  { %v1496_v2 = vadd.f32 %v1034_v37, %v772_v63  ;;  %v1503_v4 = vsel %vm805_vm0, %v1485_v61, -1e+30 }
 0x36c   :  { %v1230_v1 = vpop.f32.mrf.mxu1  ;;  %832 = vmax.xlane.f32.xlu1 %v1493_v0 }
 0x36d   :  { %v1498_v3 = vadd.f32 %v1230_v1, %v1034_v37  ;;  %v1517_v9 = vsel %vm805_vm0, %v1496_v2, -1e+30 }
 0x36e   :  { %v775_v5 = vpop.f32.mrf.mxu1  ;;  %842 = vmax.xlane.f32.xlu0 %v1503_v4 }
 0x36f   :  { %v1506_v6 = vadd.f32 %v1034_v37, %v775_v5  ;;  %v1511_v7 = vsel %vm805_vm0, %v1498_v3, -1e+30 }
 0x370   :  { %v1233_v8 = vpop.f32.mrf.mxu1  ;;  %844 = vmax.xlane.f32.xlu1 %v1511_v7 }
 0x371   :  { %v1525_v12 = vsel %vm805_vm0, %v1506_v6, -1e+30  ;;  %v1528_v14 = vadd.f32 %v1233_v8, %v1034_v37 }
 0x372   :  { %v788_v10 = vpop.f32.mrf.mxu1  ;;  %838 = vmax.xlane.f32.xlu0 %v1517_v9 }
 0x373   :  { %v1520_v11 = vadd.f32 %v1034_v37, %v788_v10  ;;  %v1548_v20 = vsel %vm805_vm0, %v1528_v14, -1e+30 }
 0x374   :  { %v1234_v13 = vpop.f32.mrf.mxu1  ;;  %840 = vmax.xlane.f32.xlu1 %v1525_v12 }
 0x375   :  { %v1533_v15 = vsel %vm805_vm0, %v1520_v11, -1e+30  ;;  %v1538_v18 = vadd.f32 %v1234_v13, %v1034_v37 }
 0x376   :  { %v791_v16 = vpop.f32.mrf.mxu1  ;;  %846 = vmax.xlane.f32.xlu0 %v1533_v15 }
 0x377   :  { %v1536_v17 = vadd.f32 %v1034_v37, %v791_v16  ;;  %v1555_v21 = vsel %vm805_vm0, %v1538_v18, -1e+30 }
 0x379   :  { %v1543_v19 = vsel %vm805_vm0, %v1536_v17, -1e+30 }
 0x37a   :  { %848 = vmax.xlane.f32.xlu1 %v1543_v19  ;;  %850 = vmax.xlane.f32.xlu0 %v1548_v20 }
 0x37e   :  { %852 = vmax.xlane.f32.xlu1 %v1555_v21 }
 0x3e5   :  { %v827_v22 = vpop.xlane.xlu1 %826 }
 0x3e6   :  { %v856_v23 = vsub.f32 %v1452_v42, %v827_v22 }
 0x3e7   :  { %v823_v24 = vpop.xlane.xlu0 %822 }
 0x3e8   :  { %v874_v25 = vmul.f32 1.442695, %v856_v23  ;;  %v854_v26 = vsub.f32 %v1460_v45, %v823_v24 }
 0x3e9   :  { %v829_v27 = vpop.xlane.xlu1 %828 }
 0x3ea   :  { %1270 = vpow2.f32 %v874_v25  ;;  %v870_v28 = vmul.f32 1.442695, %v854_v26  ;;  %v857_v29 = vsub.f32 %v809_v48, %v829_v27 }
 0x3eb   :  { %v825_v30 = vpop.xlane.xlu0 %824 }
 0x3ec   :  { %v876_v31 = vmul.f32 1.442695, %v857_v29  ;;  %v855_v32 = vsub.f32 %v807_v51, %v825_v30  ;;  %1272 = vpow2.f32 %v870_v28 }
 0x3ee   :  { %1274 = vpow2.f32 %v876_v31  ;;  %v872_v33 = vmul.f32 1.442695, %v855_v32 }
 0x3ef   :  { %v835_v34 = vpop.xlane.xlu0 %834 }
 0x3f0   :  { %v860_v35 = vsub.f32 %v812_v56, %v835_v34  ;;  %1276 = vpow2.f32 %v872_v33 }
 0x3f1   :  { %v837_v37 = vpop.xlane.xlu1 %836 }
 0x3f2   :  { %v882_v38 = vmul.f32 1.442695, %v860_v35  ;;  %v861_v40 = vsub.f32 %v813_v59, %v837_v37 }
 0x3f3   :  { %v831_v42 = vpop.xlane.xlu0 %830 }
 0x3f4   :  { %1278 = vpow2.f32 %v882_v38  ;;  %v884_v43 = vmul.f32 1.442695, %v861_v40  ;;  %v858_v45 = vsub.f32 %v810_v62, %v831_v42 }
 0x3f5   :  { %v833_v46 = vpop.xlane.xlu1 %832 }
 0x3f6   :  { %1280 = vpow2.f32 %v884_v43  ;;  %v878_v49 = vmul.f32 1.442695, %v858_v45  ;;  %v859_v48 = vsub.f32 %v1493_v0, %v833_v46 }
 0x3f7   :  { %v1561_v52 = vpop.eup %1270  ;;  %v843_v51 = vpop.xlane.xlu0 %842 }
 0x3f8   :  { %1282 = vpow2.f32 %v878_v49  ;;  %v880_v53 = vmul.f32 1.442695, %v859_v48  ;;  %v864_v56 = vsub.f32 %v1503_v4, %v843_v51  ;;  %906 = vadd.xlane.f32.xlu0 %v1561_v52 }
 0x3f9   :  { %v845_v57 = vpop.xlane.xlu1 %844  ;;  %v1565_v59 = vpop.eup %1272 }
 0x3fa   :  { %1284 = vpow2.f32 %v880_v53  ;;  %v890_v60 = vmul.f32 1.442695, %v864_v56  ;;  %v865_v62 = vsub.f32 %v1511_v7, %v845_v57 }
 0x3fb   :  { %v1568_v63 = vpop.eup %1274  ;;  %v839_v1 = vpop.xlane.xlu0 %838 }
 0x3fc   :  { %1286 = vpow2.f32 %v890_v60  ;;  %v892_v0 = vmul.f32 1.442695, %v865_v62  ;;  %v862_v5 = vsub.f32 %v1517_v9, %v839_v1  ;;  %908 = vadd.xlane.f32.xlu1 %v1568_v63  ;;  %902 = vadd.xlane.f32.xlu0 %v1565_v59 }
 0x3fd   :  { %v841_v4 = vpop.xlane.xlu1 %840  ;;  %v1574_v13 = vpop.eup %1276 }
 0x3fe   :  { %1288 = vpow2.f32 %v892_v0  ;;  %v886_v8 = vmul.f32 1.442695, %v862_v5  ;;  %v863_v10 = vsub.f32 %v1525_v12, %v841_v4 }
 0x3ff   :  { %v847_v16 = vpop.xlane.xlu0 %846 }
 0x400   :  { %1290 = vpow2.f32 %v886_v8  ;;  %v888_v7 = vmul.f32 1.442695, %v863_v10  ;;  %v866_v22 = vsub.f32 %v1533_v15, %v847_v16  ;;  %904 = vadd.xlane.f32.xlu1 %v1574_v13 }
 0x401   :  { %v1578_v23 = vpop.eup %1278 }
 0x402   :  { %1292 = vpow2.f32 %v888_v7  ;;  %v894_v9 = vmul.f32 1.442695, %v866_v22  ;;  %914 = vadd.xlane.f32.xlu0 %v1578_v23 }
 0x403   :  { %v1581_v24 = vpop.eup %1280  ;;  %v849_v25 = vpop.xlane.xlu1 %848 }
 0x404   :  { %v851_v26 = vpop.xlane.xlu0 %850  ;;  %1294 = vpow2.f32 %v894_v9  ;;  %v867_v12 = vsub.f32 %v1543_v19, %v849_v25  ;;  %916 = vadd.xlane.f32.xlu1 %v1581_v24 }
 0x405   :  { %v868_v27 = vsub.f32 %v1548_v20, %v851_v26  ;;  %v1586_v15 = vpop.eup %1282 }
 0x406   :  { %v896_v28 = vmul.f32 1.442695, %v867_v12  ;;  %910 = vadd.xlane.f32.xlu0 %v1586_v15 }
 0x407   :  { %v898_v29 = vmul.f32 1.442695, %v868_v27  ;;  %v1589_v30 = vpop.eup %1284  ;;  %v853_v31 = vpop.xlane.xlu1 %852 }
 0x408   :  { %1296 = vpow2.f32 %v896_v28  ;;  %v869_v32 = vsub.f32 %v1555_v21, %v853_v31  ;;  %912 = vadd.xlane.f32.xlu1 %v1589_v30 }
 0x409   :  { %v1593_v33 = vpop.eup %1286  ;;  %1298 = vpow2.f32 %v898_v29 }
 0x40a   :  { %v900_v19 = vmul.f32 1.442695, %v869_v32  ;;  %922 = vadd.xlane.f32.xlu0 %v1593_v33 }
 0x40b   :  { %v1596_v20 = vpop.eup %1288 }
 0x40c   :  { %1300 = vpow2.f32 %v900_v19  ;;  %924 = vadd.xlane.f32.xlu1 %v1596_v20 }
 0x40d   :  { %v1599_v34 = vpop.eup %1290 }
 0x40e   :  { %918 = vadd.xlane.f32.xlu0 %v1599_v34 }
 0x40f   :  { %v1602_v35 = vpop.eup %1292 }
 0x410   :  { %920 = vadd.xlane.f32.xlu1 %v1602_v35 }
 0x411   :  { %v1605_v21 = vpop.eup %1294 }
 0x412   :  { %926 = vadd.xlane.f32.xlu0 %v1605_v21 }
 0x415   :  { %v1608_v37 = vpop.eup %1296 }
 0x416   :  { %v1610_v38 = vpop.eup %1298  ;;  %928 = vadd.xlane.f32.xlu1 %v1608_v37 }
 0x417   :  { %930 = vadd.xlane.f32.xlu0 %v1610_v38 }
 0x419   :  { %v1614_v40 = vpop.eup %1300 }
 0x41a   :  { %932 = vadd.xlane.f32.xlu1 %v1614_v40 }
 0x481   :  { %v907_v42 = vpop.xlane.xlu0 %906 }
 0x482   :  { %1302 = vrcp.f32 %v907_v42 }
 0x485   :  { %v909_v43 = vpop.xlane.xlu1 %908  ;;  %v903_v45 = vpop.xlane.xlu0 %902 }
 0x486   :  { %1304 = vrcp.f32 %v909_v43 }
 0x487   :  { %1306 = vrcp.f32 %v903_v45 }
 0x489   :  { %v905_v46 = vpop.xlane.xlu1 %904 }
 0x48a   :  { %1308 = vrcp.f32 %v905_v46 }
 0x48b   :  { %v915_v49 = vpop.xlane.xlu0 %914 }
 0x48c   :  { %1310 = vrcp.f32 %v915_v49 }
 0x48d   :  { %v917_v48 = vpop.xlane.xlu1 %916 }
 0x48e   :  { %1312 = vrcp.f32 %v917_v48 }
 0x48f   :  { %v1303_v51 = vpop.eup %1302  ;;  %v911_v53 = vpop.xlane.xlu0 %910 }
 0x490   :  { %v939_v56 = vmul.f32 %v1303_v51, %v1561_v52  ;;  %1314 = vrcp.f32 %v911_v53 }
 0x491   :  { %v913_v57 = vpop.xlane.xlu1 %912 }
 0x492   :  { %v969_v60 = vsel %vm966_vm1, %v1445_v39, %v939_v56  ;;  %1316 = vrcp.f32 %v913_v57 }
 0x493   :  { %v1305_v62 = vpop.eup %1304  ;;  %985 = vst [vmem:[%s1733_s3 + $0x10] sm:$0xff] %v969_v60  ;;  %v923_v1 = vpop.xlane.xlu0 %922 }
 0x494   :  { %v1307_v0 = vpop.eup %1306  ;;  %v941_v5 = vmul.f32 %v1305_v62, %v1568_v63  ;;  %1318 = vrcp.f32 %v923_v1 }
 0x495   :  { %v935_v4 = vmul.f32 %v1307_v0, %v1565_v59  ;;  %v925_v52 = vpop.xlane.xlu1 %924 }
 0x496   :  { %v970_v8 = vsel %vm966_vm1, %v1455_v44, %v941_v5  ;;  %1320 = vrcp.f32 %v925_v52 }
 0x497   :  { %v1309_v39 = vpop.eup %1308  ;;  %986 = vst [vmem:[%s1733_s3 + $0x18] sm:$0xff] %v970_v8  ;;  %v967_v10 = vsel %vm966_vm1, %v1447_v41, %v935_v4  ;;  %v919_v16 = vpop.xlane.xlu0 %918 }
 0x498   :  { %983 = vst [vmem:[%s1733_s3] sm:$0xff] %v967_v10  ;;  %v937_v59 = vmul.f32 %v1309_v39, %v1574_v13  ;;  %1322 = vrcp.f32 %v919_v16 }
 0x499   :  { %v1311_v63 = vpop.eup %1310  ;;  %v921_v44 = vpop.xlane.xlu1 %920 }
 0x49a   :  { %v968_v7 = vsel %vm966_vm1, %v1463_v47, %v937_v59  ;;  %v947_v22 = vmul.f32 %v1311_v63, %v1578_v23  ;;  %1324 = vrcp.f32 %v921_v44 }
 0x49b   :  { %v1313_v9 = vpop.eup %1312  ;;  %984 = vst [vmem:[%s1733_s3 + $0x8] sm:$0xff] %v968_v7  ;;  %v927_v41 = vpop.xlane.xlu0 %926 }
 0x49c   :  { %v973_v13 = vsel %vm966_vm1, %v1468_v50, %v947_v22  ;;  %v949_v25 = vmul.f32 %v1313_v9, %v1581_v24  ;;  %1326 = vrcp.f32 %v927_v41 }
 0x49d   :  { %v1315_v26 = vpop.eup %1314  ;;  %989 = vst [vmem:[%s1733_s3 + $0x30] sm:$0xff] %v973_v13 }
 0x49e   :  { %v974_v47 = vsel %vm966_vm1, %v1475_v55, %v949_v25  ;;  %v943_v23 = vmul.f32 %v1315_v26, %v1586_v15 }
 0x49f   :  { %v1317_v12 = vpop.eup %1316  ;;  %990 = vst [vmem:[%s1733_s3 + $0x38] sm:$0xff] %v974_v47  ;;  %v929_v50 = vpop.xlane.xlu1 %928 }
 0x4a0   :  { %v971_v24 = vsel %vm966_vm1, %v1473_v54, %v943_v23  ;;  %v945_v27 = vmul.f32 %v1317_v12, %v1589_v30  ;;  %1328 = vrcp.f32 %v929_v50  ;;  %v931_v28 = vpop.xlane.xlu0 %930 }
 0x4a1   :  { %v1319_v29 = vpop.eup %1318  ;;  %987 = vst [vmem:[%s1733_s3 + $0x20] sm:$0xff] %v971_v24  ;;  %1330 = vrcp.f32 %v931_v28 }
 0x4a2   :  { %v972_v55 = vsel %vm966_vm1, %v1480_v58, %v945_v27  ;;  %v955_v15 = vmul.f32 %v1319_v29, %v1593_v33 }
 0x4a3   :  { %v1321_v31 = vpop.eup %1320  ;;  %988 = vst [vmem:[%s1733_s3 + $0x28] sm:$0xff] %v972_v55  ;;  %v933_v54 = vpop.xlane.xlu1 %932 }
 0x4a4   :  { %v977_v30 = vsel %vm966_vm1, %v1485_v61, %v955_v15  ;;  %v957_v32 = vmul.f32 %v1321_v31, %v1596_v20  ;;  %1332 = vrcp.f32 %v933_v54 }
 0x4a5   :  { %v1323_v19 = vpop.eup %1322  ;;  %993 = vst [vmem:[%s1733_s3 + $0x50] sm:$0xff] %v977_v30 }
 0x4a6   :  { %v978_v58 = vsel %vm966_vm1, %v1498_v3, %v957_v32  ;;  %v951_v33 = vmul.f32 %v1323_v19, %v1599_v34 }
 0x4a7   :  { %v1325_v42 = vpop.eup %1324  ;;  %994 = vst [vmem:[%s1733_s3 + $0x58] sm:$0xff] %v978_v58 }
 0x4a8   :  { %v975_v61 = vsel %vm966_vm1, %v1496_v2, %v951_v33  ;;  %v953_v20 = vmul.f32 %v1325_v42, %v1602_v35 }
 0x4a9   :  { %v1327_v43 = vpop.eup %1326  ;;  %991 = vst [vmem:[%s1733_s3 + $0x40] sm:$0xff] %v975_v61 }
 0x4aa   :  { %v976_v3 = vsel %vm966_vm1, %v1506_v6, %v953_v20  ;;  %v959_v34 = vmul.f32 %v1327_v43, %v1605_v21 }
 0x4ab   :  { %992 = vst [vmem:[%s1733_s3 + $0x48] sm:$0xff] %v976_v3 }
 0x4ac   :  { %v979_v2 = vsel %vm966_vm1, %v1520_v11, %v959_v34 }
 0x4ad   :  { %v1329_v35 = vpop.eup %1328  ;;  %995 = vst [vmem:[%s1733_s3 + $0x60] sm:$0xff] %v979_v2 }
 0x4ae   :  { %v1331_v45 = vpop.eup %1330  ;;  %v961_v46 = vmul.f32 %v1329_v35, %v1608_v37 }
 0x4af   :  { %v963_v6 = vmul.f32 %v1331_v45, %v1610_v38 }
 0x4b0   :  { %v980_v21 = vsel %vm966_vm1, %v1536_v17, %v961_v46 }
 0x4b1   :  { %v1333_v49 = vpop.eup %1332  ;;  %996 = vst [vmem:[%s1733_s3 + $0x68] sm:$0xff] %v980_v21  ;;  %v981_v11 = vsel %vm966_vm1, %v1528_v14, %v963_v6 }
 0x4b2   :  { %997 = vst [vmem:[%s1733_s3 + $0x70] sm:$0xff] %v981_v11  ;;  %v965_v37 = vmul.f32 %v1333_v49, %v1614_v40 }
 0x4b4   :  { %v982_v38 = vsel %vm966_vm1, %v1538_v18, %v965_v37 }
 0x4b5   :  { %998 = vst [vmem:[%s1733_s3 + $0x78] sm:$0xff] %v982_v38 }
 0x4b6   :  { %1003 = vsyncpa [#allocation3], 1 }

</bundles_post_ra>
